<compile_context>
chip_gen: v7x
topology: tpu7x:2x2x1
jax: 0.10.0
libtpu: 0.0.40
codegen_flags: <defaults>
</compile_context>

<pallas_src>
import functools

import jax
import jax.numpy as jnp
import numpy as np
from jax.experimental import pallas as pl
from jax.experimental.pallas import tpu as pltpu


def _round_up(n, m):
    return ((n + m - 1) // m) * m


# --------------------------------------------------------------------------------------
# Kernel
# --------------------------------------------------------------------------------------
def _vae_kernel(x_ref, eps_ref,
                w_e_ref, b_e_ref,          # encoder LSTM: W_ih^T packed [i|g|o] (D,3H), bias (1,3H)
                w_mulv_ref, b_mulv_ref,    # fused mu|logvar linear: (H,2L), (1,2L)
                w_dec_ref, b_dec_ref,      # decoder linear folded into decoder LSTM: (L,3D), (1,3D)
                recon_ref, mulv_ref,
                *, hidden_dim, input_dim, latent_dim):
    H, D, L = hidden_dim, input_dim, latent_dim

    # ------------- encoder LSTM, single step, h0 = c0 = 0 (f-gate trimmed) -------------
    gates_e = (jnp.dot(x_ref[...], w_e_ref[...],
                       preferred_element_type=jnp.float32) + b_e_ref[...])
    i_e = jax.nn.sigmoid(gates_e[:, 0:H])
    g_e = jnp.tanh(gates_e[:, H:2 * H])
    o_e = jax.nn.sigmoid(gates_e[:, 2 * H:3 * H])
    hd = o_e * jnp.tanh(i_e * g_e)                      # (TB, H) == hn.squeeze(0)

    # ------------- fused mu | logvar projection -------------
    mulv = (jnp.dot(hd.astype(w_mulv_ref.dtype), w_mulv_ref[...],
                    preferred_element_type=jnp.float32) + b_mulv_ref[...])   # (TB, 2L)
    mu = mulv[:, 0:L]
    logvar = mulv[:, L:2 * L]

    # ------------- reparameterization (f32) -------------
    z = mu + eps_ref[...].astype(jnp.float32) * jnp.exp(0.5 * logvar)

    # ------------- decoder: Linear folded into decoder-LSTM input matmul -------------
    gates_d = (jnp.dot(z.astype(w_dec_ref.dtype), w_dec_ref[...],
                       preferred_element_type=jnp.float32) + b_dec_ref[...])  # (TB, 3D)
    i_d = jax.nn.sigmoid(gates_d[:, 0:D])
    g_d = jnp.tanh(gates_d[:, D:2 * D])
    o_d = jax.nn.sigmoid(gates_d[:, 2 * D:3 * D])
    recon = o_d * jnp.tanh(i_d * g_d)                   # (TB, D) == out.squeeze(1)

    recon_ref[...] = recon.astype(recon_ref.dtype)
    mulv_ref[...] = mulv.astype(mulv_ref.dtype)         # lane-dense mu|logvar slab


# --------------------------------------------------------------------------------------
# Parameters (raw PyTorch layout) + host-side packing / fusing
# --------------------------------------------------------------------------------------
def init_params(key, input_dim, hidden_dim, latent_dim):
    """Raw parameters in PyTorch layout (what the nn.Module would hold)."""
    D, H, L = input_dim, hidden_dim, latent_dim
    ks = jax.random.split(key, 14)

    def u(k, shape, scale):
        return jax.random.uniform(k, shape, jnp.float32, -scale, scale)

    sH, sL, sD = 1.0 / np.sqrt(H), 1.0 / np.sqrt(L), 1.0 / np.sqrt(D)
    return dict(
        # encoder nn.LSTM(D, H), gate order i,f,g,o
        enc_w_ih=u(ks[0], (4 * H, D), sH),
        enc_w_hh=u(ks[1], (4 * H, H), sH),       # unused (h0 == 0)
        enc_b_ih=u(ks[2], (4 * H,), sH),
        enc_b_hh=u(ks[3], (4 * H,), sH),
        # nn.Linear(H, L) x 2
        w_mu=u(ks[4], (L, H), sH), b_mu=u(ks[5], (L,), sH),
        w_lv=u(ks[6], (L, H), sH), b_lv=u(ks[7], (L,), sH),
        # decoder nn.Linear(L, H)
        w_d1=u(ks[8], (H, L), sL), b_d1=u(ks[9], (H,), sL),
        # decoder nn.LSTM(H, D)
        dec_w_ih=u(ks[10], (4 * D, H), sD),
        dec_w_hh=u(ks[11], (4 * D, D), sD),      # unused (h0 == 0)
        dec_b_ih=u(ks[12], (4 * D,), sD),
        dec_b_hh=u(ks[13], (4 * D,), sD),
    )


def pack_params(raw, input_dim, hidden_dim, latent_dim, *, compute_dtype=jnp.bfloat16):
    """Trim dead f-gate columns, fuse mu|logvar, fold decoder Linear into decoder LSTM."""
    D, H, L = input_dim, hidden_dim, latent_dim

    def igo(a, n):  # keep [i | g | o] rows of PyTorch's [i, f, g, o] stacking
        return jnp.concatenate([a[0:n], a[2 * n:3 * n], a[3 * n:4 * n]], axis=0)

    # encoder LSTM (W_hh dropped; bias = b_ih + b_hh; forget gate trimmed)
    w_e = igo(raw['enc_w_ih'], H).T.astype(compute_dtype)                     # (D, 3H)
    b_e = igo(raw['enc_b_ih'] + raw['enc_b_hh'], H)[None, :].astype(jnp.float32)  # (1, 3H)

    # fused mu|logvar linear
    w_mulv = jnp.concatenate([raw['w_mu'], raw['w_lv']], axis=0).T.astype(compute_dtype)  # (H, 2L)
    b_mulv = jnp.concatenate([raw['b_mu'], raw['b_lv']])[None, :].astype(jnp.float32)     # (1, 2L)

    # decoder: fold Linear(L,H) into the LSTM input matmul (no nonlinearity between them)
    w_ih_d = igo(raw['dec_w_ih'], D).T                                        # (H, 3D) f32
    b_d = igo(raw['dec_b_ih'] + raw['dec_b_hh'], D)[None, :]                  # (1, 3D) f32
    w_d1 = raw['w_d1'].T                                                      # (L, H)  f32
    w_dec = (w_d1 @ w_ih_d).astype(compute_dtype)                             # (L, 3D)
    b_dec = (raw['b_d1'][None, :] @ w_ih_d + b_d).astype(jnp.float32)         # (1, 3D)

    return (w_e, b_e, w_mulv, b_mulv, w_dec, b_dec)


# --------------------------------------------------------------------------------------
# Wrapper
# --------------------------------------------------------------------------------------
def vae_forward(x, eps, packed, hidden_dim, latent_dim, *, compute_dtype=jnp.bfloat16):
    B, input_dim = x.shape
    D, H, L = input_dim, hidden_dim, latent_dim
    w_e, b_e, w_mulv, b_mulv, w_dec, b_dec = packed

    # Batch tiling: multiples of 8 sublanes; big tiles amortize per-step overhead.
    TILE_B = 1024 if B >= 1024 else _round_up(B, 8)
    B_pad = _round_up(B, TILE_B)
    if B_pad != B:
        x = jnp.pad(x, ((0, B_pad - B), (0, 0)))
        eps = jnp.pad(eps, ((0, B_pad - B), (0, 0)))
    x = x.astype(compute_dtype)
    eps = eps.astype(compute_dtype)

    def row_spec(feat):
        return pl.BlockSpec((TILE_B, feat), lambda i: (i, 0))

    def const_spec(arr):  # VMEM-resident across grid steps
        return pl.BlockSpec(arr.shape, lambda i: (0, 0))

    flops = 2 * B_pad * (D * 3 * H + H * 2 * L + L * 3 * D)
    transcendentals = B_pad * (4 * H + L + 4 * D)
    bytes_accessed = (B_pad * (D + L) * x.dtype.itemsize                   # bf16 inputs
                      + B_pad * (D + 2 * L) * 4                            # f32 outputs
                      + sum(int(p.size) * p.dtype.itemsize for p in packed))

    kernel = functools.partial(_vae_kernel, hidden_dim=H, input_dim=D, latent_dim=L)

    recon, mulv = pl.pallas_call(
        kernel,
        out_shape=(jax.ShapeDtypeStruct((B_pad, D), jnp.float32),
                   jax.ShapeDtypeStruct((B_pad, 2 * L), jnp.float32)),
        grid_spec=pltpu.PrefetchScalarGridSpec(
            num_scalar_prefetch=0,
            grid=(B_pad // TILE_B,),
            in_specs=[row_spec(D), row_spec(L),
                      const_spec(w_e), const_spec(b_e),
                      const_spec(w_mulv), const_spec(b_mulv),
                      const_spec(w_dec), const_spec(b_dec)],
            out_specs=(row_spec(D), row_spec(2 * L)),
        ),
        compiler_params=pltpu.CompilerParams(
            dimension_semantics=("parallel",),          # megacore / 2-TC sharding on v7x
            vmem_limit_bytes=32 * 1024 * 1024),
        cost_estimate=pl.CostEstimate(flops=flops,
                                      transcendentals=transcendentals,
                                      bytes_accessed=bytes_accessed),
    )(x, eps, w_e, b_e, w_mulv, b_mulv, w_dec, b_dec)

    recon = recon[:B]
    mu = mulv[:B, 0:L]
    logvar = mulv[:B, L:2 * L]
    return recon, mu, logvar


# --------------------------------------------------------------------------------------
# Pure-JAX f32 reference following the PyTorch forward exactly (for tolerance check)
# --------------------------------------------------------------------------------------
def vae_forward_ref(x, eps, raw, hidden_dim, latent_dim):
    H = hidden_dim
    D = x.shape[1]

    def lstm_step(x_, w_ih, b_ih, b_hh, n):
        gates = x_ @ w_ih.T + b_ih + b_hh               # h0 == 0 -> W_hh term vanishes
        i = jax.nn.sigmoid(gates[:, 0:n])
        g = jnp.tanh(gates[:, 2 * n:3 * n])
        o = jax.nn.sigmoid(gates[:, 3 * n:4 * n])
        return o * jnp.tanh(i * g)                      # c1 = f*c0 + i*g = i*g

    hd = lstm_step(x, raw['enc_w_ih'], raw['enc_b_ih'], raw['enc_b_hh'], H)
    mu = hd @ raw['w_mu'].T + raw['b_mu']
    logvar = hd @ raw['w_lv'].T + raw['b_lv']
    z = mu + eps * jnp.exp(0.5 * logvar)
    dec_in = z @ raw['w_d1'].T + raw['b_d1']
    recon = lstm_step(dec_in, raw['dec_w_ih'], raw['dec_b_ih'], raw['dec_b_hh'], D)
    return recon, mu, logvar


if __name__ == "__main__":
    B, INPUT_DIM, HIDDEN_DIM, LATENT_DIM = 8, 16, 32, 8

    key = jax.random.PRNGKey(0)
    kx, keps, kp = jax.random.split(key, 3)
    x = jax.random.normal(kx, (B, INPUT_DIM), jnp.float32)
    eps = jax.random.normal(keps, (B, LATENT_DIM), jnp.float32)   # replaces torch.randn_like
    raw = init_params(kp, INPUT_DIM, HIDDEN_DIM, LATENT_DIM)
    packed = pack_params(raw, INPUT_DIM, HIDDEN_DIM, LATENT_DIM)

    recon, mu, logvar = vae_forward(x, eps, packed, HIDDEN_DIM, LATENT_DIM)
    jax.block_until_ready((recon, mu, logvar))

    assert recon.shape == (B, INPUT_DIM)
    assert mu.shape == (B, LATENT_DIM)
    assert logvar.shape == (B, LATENT_DIM)
    assert jnp.all(jnp.isfinite(recon)) and jnp.all(jnp.isfinite(mu)) and jnp.all(jnp.isfinite(logvar))

    # Tolerance check vs. the f32 two-matmul reference: validates the f-gate trim,
    # the mu|logvar fusion, the decoder-linear fold and the bf16 operand cast.
    r_ref, m_ref, lv_ref = vae_forward_ref(x, eps, raw, HIDDEN_DIM, LATENT_DIM)
    np.testing.assert_allclose(np.asarray(recon), np.asarray(r_ref), atol=5e-2, rtol=5e-2)
    np.testing.assert_allclose(np.asarray(mu), np.asarray(m_ref), atol=5e-2, rtol=5e-2)
    np.testing.assert_allclose(np.asarray(logvar), np.asarray(lv_ref), atol=5e-2, rtol=5e-2)

    print("KERNEL_OK")
</pallas_src>

<mosaic_0001>
module attributes {stable_mosaic.version = 11 : i64} {
  func.func @_vae_kernel(%arg0: i32, %arg1: memref<8x16xbf16, #tpu.memory_space<vmem>>, %arg2: memref<8x8xbf16, #tpu.memory_space<vmem>>, %arg3: memref<16x96xbf16, #tpu.memory_space<vmem>>, %arg4: memref<1x96xf32, #tpu.memory_space<vmem>>, %arg5: memref<32x16xbf16, #tpu.memory_space<vmem>>, %arg6: memref<1x16xf32, #tpu.memory_space<vmem>>, %arg7: memref<8x48xbf16, #tpu.memory_space<vmem>>, %arg8: memref<1x48xf32, #tpu.memory_space<vmem>>, %arg9: memref<8x16xf32, #tpu.memory_space<vmem>>, %arg10: memref<8x16xf32, #tpu.memory_space<vmem>>) attributes {dimension_semantics = [#tpu.dimension_semantics<parallel>], iteration_bounds = array<i64: 1>, scalar_prefetch = 0 : i64, scratch_operands = 0 : i64, tpu.core_type = #tpu.core_type<tc>, window_params = [{transform_indices = @transform_0, window_bounds = array<i64: 8, 16>}, {transform_indices = @transform_1, window_bounds = array<i64: 8, 8>}, {pipeline_mode = #tpu.pipeline_mode<synchronous>, transform_indices = @transform_2, window_bounds = array<i64: 16, 96>}, {pipeline_mode = #tpu.pipeline_mode<synchronous>, transform_indices = @transform_3, window_bounds = array<i64: 1, 96>}, {pipeline_mode = #tpu.pipeline_mode<synchronous>, transform_indices = @transform_4, window_bounds = array<i64: 32, 16>}, {pipeline_mode = #tpu.pipeline_mode<synchronous>, transform_indices = @transform_5, window_bounds = array<i64: 1, 16>}, {pipeline_mode = #tpu.pipeline_mode<synchronous>, transform_indices = @transform_6, window_bounds = array<i64: 8, 48>}, {pipeline_mode = #tpu.pipeline_mode<synchronous>, transform_indices = @transform_7, window_bounds = array<i64: 1, 48>}, {transform_indices = @transform_8, window_bounds = array<i64: 8, 16>}, {transform_indices = @transform_9, window_bounds = array<i64: 8, 16>}]} {
    %c0 = arith.constant 0 : index
    %c0_0 = arith.constant 0 : index
    %0 = vector.load %arg1[%c0, %c0_0] : memref<8x16xbf16, #tpu.memory_space<vmem>>, vector<8x16xbf16>
    %c0_1 = arith.constant 0 : index
    %c0_2 = arith.constant 0 : index
    %1 = vector.load %arg3[%c0_1, %c0_2] : memref<16x96xbf16, #tpu.memory_space<vmem>>, vector<16x96xbf16>
    %cst = arith.constant dense<0.000000e+00> : vector<8x96xf32>
    %2 = tpu.matmul %0, %1, %cst {dimension_numbers = #tpu.dot_dimension_numbers<[1], [0], [0], [1], [0, 0, 1, 1], [], []>} : vector<8x16xbf16>, vector<16x96xbf16>, vector<8x96xf32> -> vector<8x96xf32>
    %c0_3 = arith.constant 0 : index
    %c0_4 = arith.constant 0 : index
    %3 = vector.load %arg4[%c0_3, %c0_4] : memref<1x96xf32, #tpu.memory_space<vmem>>, vector<1x96xf32>
    %4 = vector.broadcast %3 : vector<1x96xf32> to vector<8x96xf32>
    %5 = arith.addf %2, %4 : vector<8x96xf32>
    %6 = vector.extract_strided_slice %5 {offsets = [0, 0], sizes = [8, 32], strides = [1, 1]} : vector<8x96xf32> to vector<8x32xf32>
    %7 = arith.negf %6 : vector<8x32xf32>
    %8 = math.exp %7 : vector<8x32xf32>
    %cst_5 = arith.constant 1.000000e+00 : f32
    %9 = vector.broadcast %cst_5 : f32 to vector<8x32xf32>
    %10 = arith.addf %9, %8 : vector<8x32xf32>
    %11 = arith.divf %9, %10 : vector<8x32xf32>
    %12 = vector.extract_strided_slice %5 {offsets = [0, 32], sizes = [8, 32], strides = [1, 1]} : vector<8x96xf32> to vector<8x32xf32>
    %13 = math.tanh %12 : vector<8x32xf32>
    %14 = vector.extract_strided_slice %5 {offsets = [0, 64], sizes = [8, 32], strides = [1, 1]} : vector<8x96xf32> to vector<8x32xf32>
    %15 = arith.negf %14 : vector<8x32xf32>
    %16 = math.exp %15 : vector<8x32xf32>
    %cst_6 = arith.constant 1.000000e+00 : f32
    %17 = vector.broadcast %cst_6 : f32 to vector<8x32xf32>
    %18 = arith.addf %17, %16 : vector<8x32xf32>
    %19 = arith.divf %17, %18 : vector<8x32xf32>
    %20 = arith.mulf %11, %13 : vector<8x32xf32>
    %21 = math.tanh %20 : vector<8x32xf32>
    %22 = arith.mulf %19, %21 : vector<8x32xf32>
    %23 = arith.truncf %22 : vector<8x32xf32> to vector<8x32xbf16>
    %c0_7 = arith.constant 0 : index
    %c0_8 = arith.constant 0 : index
    %24 = vector.load %arg5[%c0_7, %c0_8] : memref<32x16xbf16, #tpu.memory_space<vmem>>, vector<32x16xbf16>
    %cst_9 = arith.constant dense<0.000000e+00> : vector<8x16xf32>
    %25 = tpu.matmul %23, %24, %cst_9 {dimension_numbers = #tpu.dot_dimension_numbers<[1], [0], [0], [1], [0, 0, 1, 1], [], []>} : vector<8x32xbf16>, vector<32x16xbf16>, vector<8x16xf32> -> vector<8x16xf32>
    %c0_10 = arith.constant 0 : index
    %c0_11 = arith.constant 0 : index
    %26 = vector.load %arg6[%c0_10, %c0_11] : memref<1x16xf32, #tpu.memory_space<vmem>>, vector<1x16xf32>
    %27 = vector.broadcast %26 : vector<1x16xf32> to vector<8x16xf32>
    %28 = arith.addf %25, %27 : vector<8x16xf32>
    %29 = vector.extract_strided_slice %28 {offsets = [0, 0], sizes = [8, 8], strides = [1, 1]} : vector<8x16xf32> to vector<8x8xf32>
    %30 = vector.extract_strided_slice %28 {offsets = [0, 8], sizes = [8, 8], strides = [1, 1]} : vector<8x16xf32> to vector<8x8xf32>
    %c0_12 = arith.constant 0 : index
    %c0_13 = arith.constant 0 : index
    %31 = vector.load %arg2[%c0_12, %c0_13] : memref<8x8xbf16, #tpu.memory_space<vmem>>, vector<8x8xbf16>
    %32 = arith.extf %31 : vector<8x8xbf16> to vector<8x8xf32>
    %cst_14 = arith.constant 5.000000e-01 : f32
    %33 = vector.broadcast %cst_14 : f32 to vector<8x8xf32>
    %34 = arith.mulf %33, %30 : vector<8x8xf32>
    %35 = math.exp %34 : vector<8x8xf32>
    %36 = arith.mulf %32, %35 : vector<8x8xf32>
    %37 = arith.addf %29, %36 : vector<8x8xf32>
    %38 = arith.truncf %37 : vector<8x8xf32> to vector<8x8xbf16>
    %c0_15 = arith.constant 0 : index
    %c0_16 = arith.constant 0 : index
    %39 = vector.load %arg7[%c0_15, %c0_16] : memref<8x48xbf16, #tpu.memory_space<vmem>>, vector<8x48xbf16>
    %cst_17 = arith.constant dense<0.000000e+00> : vector<8x48xf32>
    %40 = tpu.matmul %38, %39, %cst_17 {dimension_numbers = #tpu.dot_dimension_numbers<[1], [0], [0], [1], [0, 0, 1, 1], [], []>} : vector<8x8xbf16>, vector<8x48xbf16>, vector<8x48xf32> -> vector<8x48xf32>
    %c0_18 = arith.constant 0 : index
    %c0_19 = arith.constant 0 : index
    %41 = vector.load %arg8[%c0_18, %c0_19] : memref<1x48xf32, #tpu.memory_space<vmem>>, vector<1x48xf32>
    %42 = vector.broadcast %41 : vector<1x48xf32> to vector<8x48xf32>
    %43 = arith.addf %40, %42 : vector<8x48xf32>
    %44 = vector.extract_strided_slice %43 {offsets = [0, 0], sizes = [8, 16], strides = [1, 1]} : vector<8x48xf32> to vector<8x16xf32>
    %45 = arith.negf %44 : vector<8x16xf32>
    %46 = math.exp %45 : vector<8x16xf32>
    %cst_20 = arith.constant 1.000000e+00 : f32
    %47 = vector.broadcast %cst_20 : f32 to vector<8x16xf32>
    %48 = arith.addf %47, %46 : vector<8x16xf32>
    %49 = arith.divf %47, %48 : vector<8x16xf32>
    %50 = vector.extract_strided_slice %43 {offsets = [0, 16], sizes = [8, 16], strides = [1, 1]} : vector<8x48xf32> to vector<8x16xf32>
    %51 = math.tanh %50 : vector<8x16xf32>
    %52 = vector.extract_strided_slice %43 {offsets = [0, 32], sizes = [8, 16], strides = [1, 1]} : vector<8x48xf32> to vector<8x16xf32>
    %53 = arith.negf %52 : vector<8x16xf32>
    %54 = math.exp %53 : vector<8x16xf32>
    %cst_21 = arith.constant 1.000000e+00 : f32
    %55 = vector.broadcast %cst_21 : f32 to vector<8x16xf32>
    %56 = arith.addf %55, %54 : vector<8x16xf32>
    %57 = arith.divf %55, %56 : vector<8x16xf32>
    %58 = arith.mulf %49, %51 : vector<8x16xf32>
    %59 = math.tanh %58 : vector<8x16xf32>
    %60 = arith.mulf %57, %59 : vector<8x16xf32>
    %c0_22 = arith.constant 0 : index
    %c0_23 = arith.constant 0 : index
    %61 = vector.load %arg9[%c0_22, %c0_23] : memref<8x16xf32, #tpu.memory_space<vmem>>, vector<8x16xf32>
    tpu.vector_store %arg9[%c0_22, %c0_23], %60 {strides = array<i32>} : memref<8x16xf32, #tpu.memory_space<vmem>>, vector<8x16xf32>,
    %c0_24 = arith.constant 0 : index
    %c0_25 = arith.constant 0 : index
    %62 = vector.load %arg10[%c0_24, %c0_25] : memref<8x16xf32, #tpu.memory_space<vmem>>, vector<8x16xf32>
    tpu.vector_store %arg10[%c0_24, %c0_25], %28 {strides = array<i32>} : memref<8x16xf32, #tpu.memory_space<vmem>>, vector<8x16xf32>,
    return
  }
  func.func @transform_0(%arg0: i32) -> (i32, i32) {
    %c0_i32 = arith.constant 0 : i32
    %c0_i32_0 = arith.constant 0 : i32
    return %arg0, %c0_i32 : i32, i32
  }
  func.func @transform_1(%arg0: i32) -> (i32, i32) {
    %c0_i32 = arith.constant 0 : i32
    %c0_i32_0 = arith.constant 0 : i32
    return %arg0, %c0_i32 : i32, i32
  }
  func.func @transform_2(%arg0: i32) -> (i32, i32) {
    %c0_i32 = arith.constant 0 : i32
    %c0_i32_0 = arith.constant 0 : i32
    %c0_i32_1 = arith.constant 0 : i32
    return %c0_i32, %c0_i32_0 : i32, i32
  }
  func.func @transform_3(%arg0: i32) -> (i32, i32) {
    %c0_i32 = arith.constant 0 : i32
    %c0_i32_0 = arith.constant 0 : i32
    %c0_i32_1 = arith.constant 0 : i32
    return %c0_i32, %c0_i32_0 : i32, i32
  }
  func.func @transform_4(%arg0: i32) -> (i32, i32) {
    %c0_i32 = arith.constant 0 : i32
    %c0_i32_0 = arith.constant 0 : i32
    %c0_i32_1 = arith.constant 0 : i32
    return %c0_i32, %c0_i32_0 : i32, i32
  }
  func.func @transform_5(%arg0: i32) -> (i32, i32) {
    %c0_i32 = arith.constant 0 : i32
    %c0_i32_0 = arith.constant 0 : i32
    %c0_i32_1 = arith.constant 0 : i32
    return %c0_i32, %c0_i32_0 : i32, i32
  }
  func.func @transform_6(%arg0: i32) -> (i32, i32) {
    %c0_i32 = arith.constant 0 : i32
    %c0_i32_0 = arith.constant 0 : i32
    %c0_i32_1 = arith.constant 0 : i32
    return %c0_i32, %c0_i32_0 : i32, i32
  }
  func.func @transform_7(%arg0: i32) -> (i32, i32) {
    %c0_i32 = arith.constant 0 : i32
    %c0_i32_0 = arith.constant 0 : i32
    %c0_i32_1 = arith.constant 0 : i32
    return %c0_i32, %c0_i32_0 : i32, i32
  }
  func.func @transform_8(%arg0: i32) -> (i32, i32) {
    %c0_i32 = arith.constant 0 : i32
    %c0_i32_0 = arith.constant 0 : i32
    return %arg0, %c0_i32 : i32, i32
  }
  func.func @transform_9(%arg0: i32) -> (i32, i32) {
    %c0_i32 = arith.constant 0 : i32
    %c0_i32_0 = arith.constant 0 : i32
    return %arg0, %c0_i32 : i32, i32
  }
}

</mosaic_0001>

<bundles_post_ra>
// kernel: tpu_custom_call.1
= control target key start
LH: loop header
LB: loop body
LE: loop exit
PB: predicated region body
PF: predicated region fallthrough
CT: control target
= control target key end

     0   :  { %15 = vsyncpa [#allocation3], 0  ;;  %v419_v1 = vmov 0.0   ;;  %vm50_vm0 = vcmask 130048   ;;  %vm420_vm1 = vmmov 0   ;;  %s534_s0 = inlined_call_operand.vmem [shape: bf16[8,16], index: 0, kind: input, shape index: {}]   ;;  %s535_s1 = inlined_call_operand.vmem [shape: bf16[8,8], index: 1, kind: input, shape index: {}]   ;;  %s536_s2 = inlined_call_operand.vmem [shape: bf16[16,96], index: 2, kind: input, shape index: {}]   ;;  %s537_s3 = inlined_call_operand.vmem [shape: f32[1,96], index: 3, kind: input, shape index: {}]   ;;  %s538_s4 = inlined_call_operand.vmem [shape: bf16[32,16], index: 4, kind: input, shape index: {}]   ;;  %s539_s5 = inlined_call_operand.vmem [shape: f32[1,16], index: 5, kind: input, shape index: {}]   ;;  %s540_s6 = inlined_call_operand.vmem [shape: bf16[8,48], index: 6, kind: input, shape index: {}]   ;;  %s541_s7 = inlined_call_operand.vmem [shape: f32[1,48], index: 7, kind: input, shape index: {}]   ;;  %s542_s8 = inlined_call_operand.hbm [shape: f32[8,16], index: 8, kind: output, shape index: {0}]   ;;  %s543_s9 = inlined_call_operand.hbm [shape: f32[8,16], index: 9, kind: output, shape index: {1}]  }
   0x1   :  { %v350_v0 = vld [vmem:[%s536_s2] sm:$0xff]   ;;  %321 = vmatprep.subr.bf16.mxu0 %v419_v1  ;;  %327 = vmatprep.subr.bf16.mxu1 %v419_v1 }
   0x2   :  { %v34_v2 = vld [vmem:[%s534_s0] sm:$0xf]  ;;  %322 = vmatpush3.bf16.msra.mxu0 %v350_v0  ;;  %323 = vmatprep.mubr.msk.bf16.mxu0 %vm420_vm1, %v419_v1 }
   0x3   :  { %331 = vmatprep.mubr.msk.bf16.mxu1 %vm420_vm1, %v419_v1  ;;  %335 = vmatprep.subr.bf16.mxu0 %v419_v1 }
   0x4   :  { %16 = vsyncpa [#allocation5], 0  ;;  %v303_v3 = vld [vmem:[%s537_s3] ss:$0 sm:$0xff]  ;;  %s421_s0 = smov 96   ;;  %v352_v17 = vld [vmem:[%s538_s4 + $0x8] sm:$0xff]  }
   0x5   :  { %324 = vmatmul.mubr.msk.bf16.vlgmr.msra.gmra.mrb[0].mxu0 %vm50_vm0, %v34_v2  ;;  %v351_v16 = vld [vmem:[%s538_s4] sm:$0xff]   ;;  %s422_s17 = smov 64   ;;  %vm139_vm2 = vcmask 261120   ;;  %vm207_vm3 = vcmask 1043456   ;;  %s423_s21 = smov 120   ;;  %vm203_vm4 = vcmask 64512  }
   0x6   :  { %337 = vmatprep.mubr.msk.bf16.mxu0 %vm420_vm1, %v419_v1  ;;  %328 = vmatpush3.bf16.msra.mxu1 %v351_v16  ;;  %v195_v23 = vld [vmem:[%s540_s6] sm:$0xf]  ;;  %s424_s24 = smov 112  }
   0x7   :  { %329 = vmatprep.subr.bf16.mxu1 %v419_v1  ;;  %v209_v24 = vsel %vm207_vm3, %v195_v23, 0  ;;  %v307_v25 = vld [vmem:[%s539_s5] ss:$0 sm:$0xff] }
   0x8   :  { %336 = vmatpush3.bf16.msra.mxu0 %v209_v24  ;;  %v183_v34 = vld [vmem:[%s535_s1] sm:$0xf]  ;;  %s425_s1 = smov 32  }
   0x9   :  { %v184_v35 = vunpack.c.l.bf16 %v183_v34  ;;  %v311_v40 = vld [vmem:[%s541_s7] ss:$0 sm:$0xff]  ;;  %s426_s7 = smov [#allocation4]  }
   0xa   :  { %330 = vmatpush3.bf16.msra.mxu1 %v352_v17  ;;  %s291_s25 = sshll.u32 %s426_s7, 4  ;;  %s292_s25 = int_to_ptr.vmem [resolvable:$true] %s291_s25 }
   0xb   :  { %s371_s26 = scalar_lea.vmem %s292_s25, 128  ;;  %p376_p1 = scmp.lt.s32.totalorder %s292_s25, %s292_s25 }
   0xc   :  { %p372_p0 = scmp.ne.s32.totalorder %s292_s25, %s371_s26  ;;  %p377_p2 = scmp.lt.s32.totalorder %s371_s26, %s371_s26 }
   0xe   :  { %p378_p3 = por %p377_p2, %p376_p1 }
  0x10   :  { %p379_p4 = pnand %p378_p3, %p372_p0 }
  0xd8   :  { %v88_v4 = vpop.f32.mrb[0].mxu0 }
  0xd9   :  { %v89_v5 = vadd.f32 %v303_v3, %v88_v4  ;;  %v325_v6 = vpop.f32.mrb[1].mxu0 }
  0xda   :  { %v91_v7 = vpop.f32.mrb[2].mxu0 }
  0xdb   :  { %353 = vtanh.f32 %v89_v5  ;;  %v326_v8 = vpop.f32.mrb[3].mxu0  ;;  %v306_v10 = vmul.f32 -1.442695, %v89_v5 }
  0xdd   :  { %355 = vpow2.f32 %v306_v10 }
  0xe5   :  { %v354_v9 = vpop.eup %353 }
  0xe6   :  { %102 = vrot.lane.b32.xlu0 %v354_v9, %s421_s0 }
  0xe7   :  { %v356_v11 = vpop.eup %355 }
  0xe8   :  { %v97_v12 = vadd.f32 1.0, %v356_v11 }
  0xea   :  { %357 = vrcp.f32 %v97_v12 }
  0xf4   :  { %v358_v13 = vpop.eup %357 }
 0x158   :  { %v103_v14 = vpop.permute.xlu0 %102 }
 0x159   :  { %v105_v15 = vmul.f32 %v358_v13, %v103_v14 }
 0x15b   :  { %359 = vtanh.f32 %v105_v15 }
 0x165   :  { %v360_v18 = vpop.eup %359 }
 0x166   :  { %108 = vrot.lane.b32.xlu0 %v360_v18, %s422_s17 }
 0x1d8   :  { %v109_v19 = vpop.permute.xlu0 %108 }
 0x1d9   :  { %v111_v20 = vmul.f32 %v358_v13, %v109_v19 }
 0x1db   :  { %v112_v21 = vpack.c.bf16 %v111_v20, %v111_v20 }
 0x1dd   :  { %125 = vrot.lane.b32.xlu1 %v112_v21, %s422_s17 }
 0x24f   :  { %v126_v22 = vpop.permute.xlu1 %125 }
 0x250   :  { %332 = vmatmul.mubr.msk.bf16.vlgmr.msra.gmra.mrb[0].mxu1 %vm139_vm2, %v126_v22 }
 0x323   :  { %v177_v26 = vpop.f32.mrb[0].mxu1 }
 0x324   :  { %v178_v27 = vadd.f32 %v307_v25, %v177_v26  ;;  %v333_v28 = vpop.f32.mrb[1].mxu1 }
 0x325   :  { %v180_v29 = vpop.f32.mrb[2].mxu1 }
 0x326   :  { %v185_v30 = vmul.f32 0.5, %v178_v27  ;;  %274 = vst.msk [vmem:[#allocation4] sm:$0xff] %vm50_vm0, %v178_v27  ;;  %v334_v31 = vpop.f32.mrb[3].mxu1 }
 0x328   :  { %v186_v32 = vmul.f32 1.442695, %v185_v30 }
 0x32a   :  { %361 = vpow2.f32 %v186_v32 }
 0x334   :  { %v362_v33 = vpop.eup %361 }
 0x335   :  { %189 = vrot.lane.b32.xlu1 %v362_v33, %s423_s21 }
 0x3a7   :  { %v190_v36 = vpop.permute.xlu1 %189 }
 0x3a8   :  { %v192_v37 = vmul.f32 %v190_v36, %v184_v35 }
 0x3aa   :  { %v193_v38 = vadd.f32 %v192_v37, %v178_v27 }
 0x3ac   :  { %v194_v39 = vpack.c.bf16 %v193_v38, %v193_v38 }
 0x3ae   :  { %338 = vmatmul.mubr.msk.bf16.vlgmr.msra.gmra.mrb[4].mxu0 %vm203_vm4, %v194_v39 }
 0x481   :  { %v245_v41 = vpop.f32.mrb[4].mxu0 }
 0x482   :  { %v246_v42 = vadd.f32 %v311_v40, %v245_v41  ;;  %v339_v43 = vpop.f32.mrb[5].mxu0 }
 0x483   :  { %v248_v44 = vpop.f32.mrb[6].mxu0 }
 0x484   :  { %363 = vtanh.f32 %v246_v42  ;;  %v340_v45 = vpop.f32.mrb[7].mxu0  ;;  %v313_v47 = vmul.f32 -1.442695, %v246_v42 }
 0x486   :  { %365 = vpow2.f32 %v313_v47 }
 0x48e   :  { %v364_v46 = vpop.eup %363 }
 0x48f   :  { %259 = vrot.lane.b32.xlu0 %v364_v46, %s424_s24 }
 0x490   :  { %v366_v48 = vpop.eup %365 }
 0x491   :  { %v254_v49 = vadd.f32 1.0, %v366_v48 }
 0x493   :  { %367 = vrcp.f32 %v254_v49 }
 0x49d   :  { %v368_v50 = vpop.eup %367 }
 0x501   :  { %v260_v51 = vpop.permute.xlu0 %259 }
 0x502   :  { %v262_v52 = vmul.f32 %v368_v50, %v260_v51 }
 0x504   :  { %369 = vtanh.f32 %v262_v52 }
 0x50e   :  { %v370_v53 = vpop.eup %369 }
 0x50f   :  { %265 = vrot.lane.b32.xlu1 %v370_v53, %s425_s1 }
 0x510   :  { %382 = shalt.err (!%p379_p4)
}
 0x511   :  { %s383_s29 = scalar_lea.hbm %s543_s9, 128 }
 0x512   :  { %p384_p5 = scmp.ne.s32.totalorder %s543_s9, %s383_s29  ;;  %p387_p6 = scmp.lt.u32.totalorder %s383_s29, %s543_s9 }
 0x514   :  { %p389_p7 = pnand %p387_p6, %p384_p5 }
 0x516   :  { %392 = shalt.err (!%p389_p7)
}
 0x517   :  { %294 = dma.vmem_to_hbm [thread:$0]  %s292_s25, 128, %s543_s9, [#allocation5]  }
 0x518   :  { %s427_s2 = smov [#allocation2]  }
 0x519   :  { %s281_s3 = sshll.u32 %s427_s2, 4  ;;  %s282_s3 = int_to_ptr.vmem [resolvable:$true] %s281_s3 }
 0x51a   :  { %s393_s15 = scalar_lea.vmem %s282_s3, 128  ;;  %p398_p9 = scmp.lt.s32.totalorder %s282_s3, %s282_s3 }
 0x51b   :  { %p394_p8 = scmp.ne.s32.totalorder %s282_s3, %s393_s15  ;;  %p399_p10 = scmp.lt.s32.totalorder %s393_s15, %s393_s15 }
 0x51d   :  { %p400_p11 = por %p399_p10, %p398_p9 }
 0x51f   :  { %p401_p12 = pnand %p400_p11, %p394_p8 }
 0x581   :  { %v266_v54 = vpop.permute.xlu1 %265 }
 0x582   :  { %v268_v55 = vmul.f32 %v368_v50, %v266_v54 }
 0x584   :  { %270 = vrot.lane.b32.xlu0 %v268_v55, %s421_s0 }
 0x5f6   :  { %v271_v56 = vpop.permute.xlu0 %270 }
 0x5f7   :  { %273 = vst.msk [vmem:[#allocation2] sm:$0xff] %vm50_vm0, %v271_v56 }
 0x5f8   :  { %404 = shalt.err (!%p401_p12)
}
 0x5f9   :  { %s405_s9 = scalar_lea.hbm %s542_s8, 128 }
 0x5fa   :  { %p406_p13 = scmp.ne.s32.totalorder %s542_s8, %s405_s9  ;;  %p409_p0 = scmp.lt.u32.totalorder %s405_s9, %s542_s8 }
 0x5fc   :  { %p411_p1 = pnand %p409_p0, %p406_p13 }
 0x5fe   :  { %414 = shalt.err (!%p411_p1)
}
 0x5ff   :  { %284 = dma.vmem_to_hbm [thread:$0]  %s282_s3, 128, %s542_s8, [#allocation3]  }
 0x600   :  { %415 = dma.done.wait [#allocation3], 128  }
 0x601   :  { %416 = vsyncadd [#allocation3], 4294967168 }
 0x602   :  { %417 = dma.done.wait [#allocation5], 128  }
 0x603   :  { %418 = vsyncadd [#allocation5], 4294967168 }
 0x604   :  { %301 = vsyncpa [#allocation3], 1 }
 0x605   :  { %302 = vsyncpa [#allocation5], 1 }

</bundles_post_ra>
